<compile_context>
chip_gen: v7x
topology: tpu7x:2x2x1
jax: 0.10.0
libtpu: 0.0.40
codegen_flags: <defaults>
</compile_context>

<pallas_src>
import functools

import jax
import jax.numpy as jnp
from jax.experimental import pallas as pl
from jax.experimental.pallas import tpu as pltpu

D_IN = 100  # logical feature width of FATEModel


def fate_kernel(x_ref, w1_ref, b1_ref, w2_ref, b2_ref, o_ref):
    # layer1: Linear + ReLU (f32 MXU accumulate)
    h = jnp.dot(x_ref[...], w1_ref[...], preferred_element_type=jnp.float32)
    h = jnp.maximum(h + b1_ref[...], 0.0)            # (TB,100) + (1,100) broadcast
    # layer2: Linear + ReLU
    h = h.astype(w2_ref.dtype)                       # bf16 path casts; f32 path no-op
    o = jnp.dot(h, w2_ref[...], preferred_element_type=jnp.float32)
    o_ref[...] = jnp.maximum(o + b2_ref[...], 0.0).astype(o_ref.dtype)


def _round_up(v, m):
    return ((v + m - 1) // m) * m


@functools.partial(jax.jit, static_argnames=("block_b", "use_bf16"))
def fate_forward(x, w1, b1, w2, b2, *, block_b=4096, use_bf16=False):
    """x: (B,100) f32; w1/w2: (100,100) stored as (in,out); b1/b2: (1,100) f32."""
    B, D = x.shape
    assert D == D_IN and w1.shape == (D_IN, D_IN) and w2.shape == (D_IN, D_IN)

    # --- batch-tile selection -------------------------------------------------
    #  * >= 2 tiles whenever B permits (v7x has 2 TensorCores to shard across)
    #  * tile rows a multiple of 8 (sublane granularity); trailing partial block is
    #    handled by Pallas edge clipping, so over-tiling waste is <= ~8 rows/tile.
    n_tiles = max(pl.cdiv(B, block_b), 2 if B >= 16 else 1)
    if n_tiles == 1:
        TB = B                                   # single full-array block, no OOB rows
    else:
        TB = _round_up(pl.cdiv(B, n_tiles), 8)
        n_tiles = pl.cdiv(B, TB)

    in_dtype = jnp.bfloat16 if use_bf16 else x.dtype
    xk = x.astype(in_dtype)
    w1k = w1.astype(in_dtype)
    w2k = w2.astype(in_dtype)
    b1k = b1.reshape(1, D_IN).astype(jnp.float32)
    b2k = b2.reshape(1, D_IN).astype(jnp.float32)

    return pl.pallas_call(
        fate_kernel,
        out_shape=jax.ShapeDtypeStruct((B, D_IN), jnp.float32),
        grid=(n_tiles,),
        in_specs=[
            pl.BlockSpec((TB, D_IN), lambda i: (i, 0)),       # x: tiled over batch
            pl.BlockSpec((D_IN, D_IN), lambda i: (0, 0)),     # w1: VMEM-resident
            pl.BlockSpec((1, D_IN), lambda i: (0, 0)),        # b1
            pl.BlockSpec((D_IN, D_IN), lambda i: (0, 0)),     # w2
            pl.BlockSpec((1, D_IN), lambda i: (0, 0)),        # b2
        ],
        out_specs=pl.BlockSpec((TB, D_IN), lambda i: (i, 0)),
        compiler_params=pltpu.CompilerParams(
            dimension_semantics=("parallel",),   # shard batch tiles across v7x's 2 TCs
        ),
    )(xk, w1k, b1k, w2k, b2k)


def init_params(key):
    """Deterministic init mimicking nn.Linear's uniform(-1/sqrt(in), 1/sqrt(in))."""
    k1, k2, k3, k4 = jax.random.split(key, 4)
    bound = 1.0 / jnp.sqrt(100.0)
    # PyTorch stores W as (out,in); we store its transpose (in,out) directly.
    w1_t = jax.random.uniform(k1, (D_IN, D_IN), jnp.float32, -bound, bound)
    b1 = jax.random.uniform(k2, (1, D_IN), jnp.float32, -bound, bound)
    w2_t = jax.random.uniform(k3, (D_IN, D_IN), jnp.float32, -bound, bound)
    b2 = jax.random.uniform(k4, (1, D_IN), jnp.float32, -bound, bound)
    return w1_t, b1, w2_t, b2


def _reference(x, w1_t, b1, w2_t, b2):
    h = jnp.maximum(x @ w1_t + b1, 0.0)
    return jnp.maximum(h @ w2_t + b2, 0.0)


if __name__ == "__main__":
    key = jax.random.PRNGKey(0)
    kx, kp, kx2 = jax.random.split(key, 3)
    w1_t, b1, w2_t, b2 = init_params(kp)

    # Small case: single batch tile (full-array block, no OOB rows).
    B = 8
    x = jax.random.normal(kx, (B, D_IN), jnp.float32)
    out = jax.block_until_ready(fate_forward(x, w1_t, b1, w2_t, b2))
    ref = _reference(x, w1_t, b1, w2_t, b2)
    assert out.shape == (B, D_IN)
    assert jnp.allclose(out, ref, atol=1e-5, rtol=1e-5)

    # Non-divisible batch: 3 tiles, trailing partial block -> validates edge-clipping
    # (no wrapper padding, no output slice).
    B2 = 300
    x2 = jax.random.normal(kx2, (B2, D_IN), jnp.float32)
    out2 = jax.block_until_ready(fate_forward(x2, w1_t, b1, w2_t, b2, block_b=128))
    ref2 = _reference(x2, w1_t, b1, w2_t, b2)
    assert out2.shape == (B2, D_IN)
    assert jnp.allclose(out2, ref2, atol=1e-5, rtol=1e-5)

    # Opt-in bf16 inputs / f32 accumulate (bandwidth + v5e MXU win; looser tolerance).
    out3 = jax.block_until_ready(fate_forward(x2, w1_t, b1, w2_t, b2, use_bf16=True))
    assert out3.shape == (B2, D_IN)
    assert jnp.allclose(out3, ref2, atol=3e-2, rtol=3e-2)

    print("KERNEL_OK")
</pallas_src>

<mosaic_0001>
module attributes {stable_mosaic.version = 11 : i64} {
  func.func @fate_kernel(%arg0: i32, %arg1: memref<8x100xf32, #tpu.memory_space<vmem>>, %arg2: memref<100x100xf32, #tpu.memory_space<vmem>>, %arg3: memref<1x100xf32, #tpu.memory_space<vmem>>, %arg4: memref<100x100xf32, #tpu.memory_space<vmem>>, %arg5: memref<1x100xf32, #tpu.memory_space<vmem>>, %arg6: memref<8x100xf32, #tpu.memory_space<vmem>>) attributes {dimension_semantics = [#tpu.dimension_semantics<parallel>], iteration_bounds = array<i64: 1>, scalar_prefetch = 0 : i64, scratch_operands = 0 : i64, tpu.core_type = #tpu.core_type<tc>, window_params = [{transform_indices = @transform_0, window_bounds = array<i64: 8, 100>}, {pipeline_mode = #tpu.pipeline_mode<synchronous>, transform_indices = @transform_1, window_bounds = array<i64: 100, 100>}, {pipeline_mode = #tpu.pipeline_mode<synchronous>, transform_indices = @transform_2, window_bounds = array<i64: 1, 100>}, {pipeline_mode = #tpu.pipeline_mode<synchronous>, transform_indices = @transform_3, window_bounds = array<i64: 100, 100>}, {pipeline_mode = #tpu.pipeline_mode<synchronous>, transform_indices = @transform_4, window_bounds = array<i64: 1, 100>}, {transform_indices = @transform_5, window_bounds = array<i64: 8, 100>}]} {
    %c0 = arith.constant 0 : index
    %c0_0 = arith.constant 0 : index
    %0 = vector.load %arg1[%c0, %c0_0] : memref<8x100xf32, #tpu.memory_space<vmem>>, vector<8x100xf32>
    %c0_1 = arith.constant 0 : index
    %c0_2 = arith.constant 0 : index
    %1 = vector.load %arg2[%c0_1, %c0_2] : memref<100x100xf32, #tpu.memory_space<vmem>>, vector<100x100xf32>
    %cst = arith.constant dense<0.000000e+00> : vector<8x100xf32>
    %2 = tpu.matmul %0, %1, %cst {dimension_numbers = #tpu.dot_dimension_numbers<[1], [0], [0], [1], [0, 0, 1, 1], [], []>} : vector<8x100xf32>, vector<100x100xf32>, vector<8x100xf32> -> vector<8x100xf32>
    %c0_3 = arith.constant 0 : index
    %c0_4 = arith.constant 0 : index
    %3 = vector.load %arg3[%c0_3, %c0_4] : memref<1x100xf32, #tpu.memory_space<vmem>>, vector<1x100xf32>
    %4 = vector.broadcast %3 : vector<1x100xf32> to vector<8x100xf32>
    %5 = arith.addf %2, %4 : vector<8x100xf32>
    %cst_5 = arith.constant 0.000000e+00 : f32
    %6 = vector.broadcast %cst_5 : f32 to vector<8x100xf32>
    %7 = arith.maximumf %5, %6 : vector<8x100xf32>
    %c0_6 = arith.constant 0 : index
    %c0_7 = arith.constant 0 : index
    %8 = vector.load %arg4[%c0_6, %c0_7] : memref<100x100xf32, #tpu.memory_space<vmem>>, vector<100x100xf32>
    %cst_8 = arith.constant dense<0.000000e+00> : vector<8x100xf32>
    %9 = tpu.matmul %7, %8, %cst_8 {dimension_numbers = #tpu.dot_dimension_numbers<[1], [0], [0], [1], [0, 0, 1, 1], [], []>} : vector<8x100xf32>, vector<100x100xf32>, vector<8x100xf32> -> vector<8x100xf32>
    %c0_9 = arith.constant 0 : index
    %c0_10 = arith.constant 0 : index
    %10 = vector.load %arg5[%c0_9, %c0_10] : memref<1x100xf32, #tpu.memory_space<vmem>>, vector<1x100xf32>
    %11 = vector.broadcast %10 : vector<1x100xf32> to vector<8x100xf32>
    %12 = arith.addf %9, %11 : vector<8x100xf32>
    %cst_11 = arith.constant 0.000000e+00 : f32
    %13 = vector.broadcast %cst_11 : f32 to vector<8x100xf32>
    %14 = arith.maximumf %12, %13 : vector<8x100xf32>
    %c0_12 = arith.constant 0 : index
    %c0_13 = arith.constant 0 : index
    %15 = vector.load %arg6[%c0_12, %c0_13] : memref<8x100xf32, #tpu.memory_space<vmem>>, vector<8x100xf32>
    tpu.vector_store %arg6[%c0_12, %c0_13], %14 {strides = array<i32>} : memref<8x100xf32, #tpu.memory_space<vmem>>, vector<8x100xf32>,
    return
  }
  func.func @transform_0(%arg0: i32) -> (i32, i32) {
    %c0_i32 = arith.constant 0 : i32
    %c0_i32_0 = arith.constant 0 : i32
    return %arg0, %c0_i32 : i32, i32
  }
  func.func @transform_1(%arg0: i32) -> (i32, i32) {
    %c0_i32 = arith.constant 0 : i32
    %c0_i32_0 = arith.constant 0 : i32
    %c0_i32_1 = arith.constant 0 : i32
    return %c0_i32, %c0_i32_0 : i32, i32
  }
  func.func @transform_2(%arg0: i32) -> (i32, i32) {
    %c0_i32 = arith.constant 0 : i32
    %c0_i32_0 = arith.constant 0 : i32
    %c0_i32_1 = arith.constant 0 : i32
    return %c0_i32, %c0_i32_0 : i32, i32
  }
  func.func @transform_3(%arg0: i32) -> (i32, i32) {
    %c0_i32 = arith.constant 0 : i32
    %c0_i32_0 = arith.constant 0 : i32
    %c0_i32_1 = arith.constant 0 : i32
    return %c0_i32, %c0_i32_0 : i32, i32
  }
  func.func @transform_4(%arg0: i32) -> (i32, i32) {
    %c0_i32 = arith.constant 0 : i32
    %c0_i32_0 = arith.constant 0 : i32
    %c0_i32_1 = arith.constant 0 : i32
    return %c0_i32, %c0_i32_0 : i32, i32
  }
  func.func @transform_5(%arg0: i32) -> (i32, i32) {
    %c0_i32 = arith.constant 0 : i32
    %c0_i32_0 = arith.constant 0 : i32
    return %arg0, %c0_i32 : i32, i32
  }
}

</mosaic_0001>

<bundles_post_ra>
// kernel: fate_forward.1
= control target key start
LH: loop header
LB: loop body
LE: loop exit
PB: predicated region body
PF: predicated region fallthrough
CT: control target
= control target key end

     0   :  { %10 = vsyncpa [#allocation3], 0  ;;  %s623_s0 = inlined_call_operand.hbm [shape: f32[8,100], index: 0, kind: input, shape index: {}]   ;;  %s624_s1 = inlined_call_operand.hbm [shape: f32[100,100], index: 1, kind: input, shape index: {}]   ;;  %s625_s2 = inlined_call_operand.vmem [shape: f32[1,100], index: 2, kind: input, shape index: {}]   ;;  %s626_s3 = inlined_call_operand.hbm [shape: f32[100,100], index: 3, kind: input, shape index: {}]   ;;  %s627_s4 = inlined_call_operand.vmem [shape: f32[1,100], index: 4, kind: input, shape index: {}]   ;;  %s628_s5 = inlined_call_operand.hbm [shape: f32[8,100], index: 5, kind: output, shape index: {}]  }
   0x1   :  { %11 = vsyncpa [#allocation6], 0 }
   0x2   :  { %12 = vsyncpa [#allocation4], 0  ;;  %s505_s18 = smov [#allocation5]   ;;  %s411_s22 = scalar_lea.hbm %s624_s1, 1664 }
   0x3   :  { %s28_s19 = sshll.u32 %s505_s18, 4  ;;  %p412_p0 = scmp.ne.s32.totalorder %s624_s1, %s411_s22  ;;  %s29_s19 = int_to_ptr.vmem [resolvable:$true] %s28_s19 }
   0x4   :  { %p415_p1 = scmp.lt.u32.totalorder %s411_s22, %s624_s1 }
   0x6   :  { %p417_p2 = pnand %p415_p1, %p412_p0 }
   0x8   :  { %420 = shalt.err (!%p417_p2)
}
   0x9   :  { %s421_s27 = scalar_lea.vmem %s29_s19, 1664  ;;  %p426_p4 = scmp.lt.s32.totalorder %s29_s19, %s29_s19 }
   0xa   :  { %p422_p3 = scmp.ne.s32.totalorder %s29_s19, %s421_s27  ;;  %p427_p5 = scmp.lt.s32.totalorder %s421_s27, %s421_s27 }
   0xc   :  { %p428_p6 = por %p427_p5, %p426_p4 }
   0xe   :  { %p429_p7 = pnand %p428_p6, %p422_p3 }
  0x10   :  { %432 = shalt.err (!%p429_p7)
}
  0x11   :  { %s506_s28 = smov 128   ;;  %s507_s29 = smov 8  }
  0x12   :  { %34 = dma.hbm_to_vmem [thread:$0]  %s624_s1, 1664, %s29_s19, [#allocation6], %s506_s28, %s506_s28, %s507_s29  }
  0x13   :  { %s508_s7 = smov [#allocation2]   ;;  %s509_s9 = smov [#allocation7]  }
  0x14   :  { %s19_s8 = sshll.u32 %s508_s7, 4  ;;  %s42_s10 = sshll.u32 %s509_s9, 4  ;;  %s20_s8 = int_to_ptr.vmem [resolvable:$true] %s19_s8  ;;  %s43_s10 = int_to_ptr.vmem [resolvable:$true] %s42_s10 }
  0x15   :  { %s433_s13 = scalar_lea.hbm %s623_s0, 128 }
  0x16   :  { %p434_p8 = scmp.ne.s32.totalorder %s623_s0, %s433_s13  ;;  %p437_p9 = scmp.lt.u32.totalorder %s433_s13, %s623_s0 }
  0x18   :  { %p439_p10 = pnand %p437_p9, %p434_p8 }
  0x1a   :  { %442 = shalt.err (!%p439_p10)
}
  0x1b   :  { %s443_s1 = scalar_lea.vmem %s20_s8, 128  ;;  %p448_p12 = scmp.lt.s32.totalorder %s20_s8, %s20_s8 }
  0x1c   :  { %p444_p11 = scmp.ne.s32.totalorder %s20_s8, %s443_s1  ;;  %p449_p13 = scmp.lt.s32.totalorder %s443_s1, %s443_s1 }
  0x1e   :  { %p450_p0 = por %p449_p13, %p448_p12 }
  0x20   :  { %p451_p1 = pnand %p450_p0, %p444_p11 }
  0x22   :  { %454 = shalt.err (!%p451_p1)
}
  0x23   :  { %22 = dma.hbm_to_vmem [thread:$0]  %s623_s0, 128, %s20_s8, [#allocation3]  }
  0x24   :  { %s455_s22 = scalar_lea.hbm %s626_s3, 1664 }
  0x25   :  { %p456_p2 = scmp.ne.s32.totalorder %s626_s3, %s455_s22  ;;  %p459_p3 = scmp.lt.u32.totalorder %s455_s22, %s626_s3 }
  0x27   :  { %p461_p4 = pnand %p459_p3, %p456_p2 }
  0x29   :  { %464 = shalt.err (!%p461_p4)
}
  0x2a   :  { %s465_s27 = scalar_lea.vmem %s43_s10, 1664  ;;  %p470_p6 = scmp.lt.s32.totalorder %s43_s10, %s43_s10 }
  0x2b   :  { %p466_p5 = scmp.ne.s32.totalorder %s43_s10, %s465_s27  ;;  %p471_p7 = scmp.lt.s32.totalorder %s465_s27, %s465_s27 }
  0x2d   :  { %p472_p8 = por %p471_p7, %p470_p6 }
  0x2f   :  { %p473_p9 = pnand %p472_p8, %p466_p5 }
  0x31   :  { %476 = shalt.err (!%p473_p9)
}
  0x32   :  { %48 = dma.hbm_to_vmem [thread:$0]  %s626_s3, 1664, %s43_s10, [#allocation6], %s506_s28, %s506_s28, %s507_s29  }
  0x33   :  { %499 = dma.done.wait [#allocation3], 128  }
  0x34   :  { %500 = vsyncadd [#allocation3], 4294967168 }
  0x35   :  { %501 = dma.done.wait [#allocation6], 3328  }
  0x36   :  { %502 = vsyncadd [#allocation6], 4294963968  ;;  %v510_v0 = vmov 0.0|0.0   ;;  %vm511_vm0 = vmmov 0   ;;  %v512_v1 = vmov 0.0   ;;  %v61_v2 = vld [vmem:[#allocation5] sm:$0xff] }
  0x37   :  { %366 = vmatprep.subr.bf16.mxu0 %v510_v0  ;;  %334 = vmatprep.mubr.msk.f32.mxu0 %vm511_vm0, %v512_v1  ;;  %v62_v3 = vld [vmem:[#allocation5 + $0x8] sm:$0xff]  ;;  %v63_v4 = vld [vmem:[#allocation5 + $0x10] sm:$0xff]  ;;  %v64_v6 = vld [vmem:[#allocation5 + $0x18] sm:$0xff]  ;;  %vm85_vm1 = vcmask 1043456   ;;  %vm81_vm2 = vcmask 818176   ;;  %s513_s7 = smov [#allocation8]  }
  0x38   :  { %384 = vmatprep.subr.bf16.mxu1 %v510_v0  ;;  %363 = vmatprep.mubr.msk.f32.mxu1 %vm511_vm0, %v512_v1  ;;  %v367_v5 = vpack.c.bf16 %v62_v3, %v61_v2  ;;  %v370_v7 = vpack.c.bf16 %v64_v6, %v63_v4  ;;  %v65_v8 = vld [vmem:[#allocation5 + $0x20] sm:$0xff]  ;;  %v66_v9 = vld [vmem:[#allocation5 + $0x28] sm:$0xff]  ;;  %v161_v11 = vld [vmem:[#allocation7 + $0x8] sm:$0xff]  ;;  %s264_s8 = sshll.u32 %s513_s7, 4  ;;  %s265_s8 = int_to_ptr.vmem [resolvable:$true] %s264_s8 }
  0x39   :  { %v160_v10 = vld [vmem:[#allocation7] sm:$0xff]  ;;  %v162_v12 = vld [vmem:[#allocation7 + $0x10] sm:$0xff]  ;;  %v163_v13 = vld [vmem:[#allocation7 + $0x18] sm:$0xff]  ;;  %v373_v15 = vpack.c.bf16 %v66_v9, %v65_v8  ;;  %p482_p11 = scmp.lt.s32.totalorder %s265_s8, %s265_s8 }
  0x3a   :  { %368 = vmatpush3.bf16.msra.mxu0 %v367_v5  ;;  %v385_v14 = vpack.c.bf16 %v161_v11, %v160_v10  ;;  %v67_v16 = vld [vmem:[#allocation5 + $0x30] sm:$0xff]  ;;  %v68_v17 = vld [vmem:[#allocation5 + $0x38] sm:$0xff]  ;;  %v388_v18 = vpack.c.bf16 %v163_v13, %v162_v12  ;;  %v164_v19 = vld [vmem:[#allocation7 + $0x20] sm:$0xff] }
  0x3b   :  { %369 = vmatprep.subr.bf16.mxu0 %v510_v0  ;;  %v165_v20 = vld [vmem:[#allocation7 + $0x28] sm:$0xff]  ;;  %v376_v21 = vpack.c.bf16 %v68_v17, %v67_v16  ;;  %v69_v22 = vld [vmem:[#allocation5 + $0x40] sm:$0xff]  ;;  %v70_v23 = vld [vmem:[#allocation5 + $0x48] sm:$0xff] }
  0x3c   :  { %386 = vmatpush3.bf16.msra.mxu1 %v385_v14  ;;  %v391_v24 = vpack.c.bf16 %v165_v20, %v164_v19  ;;  %v166_v25 = vld [vmem:[#allocation7 + $0x30] sm:$0xff]  ;;  %v167_v26 = vld [vmem:[#allocation7 + $0x38] sm:$0xff]  ;;  %v379_v27 = vpack.c.bf16 %v70_v23, %v69_v22  ;;  %v71_v28 = vld [vmem:[#allocation5 + $0x50] sm:$0xff] }
  0x3d   :  { %387 = vmatprep.subr.bf16.mxu1 %v510_v0  ;;  %v72_v29 = vld [vmem:[#allocation5 + $0x58] sm:$0xff]  ;;  %v394_v30 = vpack.c.bf16 %v167_v26, %v166_v25  ;;  %v168_v31 = vld [vmem:[#allocation7 + $0x40] sm:$0xff]  ;;  %v169_v32 = vld [vmem:[#allocation7 + $0x48] sm:$0xff] }
  0x3e   :  { %371 = vmatpush3.bf16.msra.mxu0 %v370_v7  ;;  %v382_v33 = vpack.c.bf16 %v72_v29, %v71_v28  ;;  %v397_v34 = vpack.c.bf16 %v169_v32, %v168_v31  ;;  %v73_v35 = vld [vmem:[#allocation5 + $0x60] sm:$0xf]  ;;  %v60_v36 = vld [vmem:[#allocation2] sm:$0xff]  ;;  %v172_v40 = vld [vmem:[#allocation7 + $0x60] sm:$0xf] }
  0x3f   :  { %372 = vmatprep.subr.bf16.mxu0 %v510_v0  ;;  %v170_v37 = vld [vmem:[#allocation7 + $0x50] sm:$0xff]  ;;  %v171_v38 = vld [vmem:[#allocation7 + $0x58] sm:$0xff] }
  0x40   :  { %389 = vmatpush3.bf16.msra.mxu1 %v388_v18  ;;  %v400_v39 = vpack.c.bf16 %v171_v38, %v170_v37  ;;  %v274_v41 = vld [vmem:[%s625_s2] ss:$0 sm:$0xff]  ;;  %s477_s2 = scalar_lea.vmem %s265_s8, 128 }
  0x41   :  { %390 = vmatprep.subr.bf16.mxu1 %v510_v0  ;;  %v277_v46 = vld [vmem:[%s627_s4] ss:$0 sm:$0xff]  ;;  %p478_p10 = scmp.ne.s32.totalorder %s265_s8, %s477_s2  ;;  %p483_p12 = scmp.lt.s32.totalorder %s477_s2, %s477_s2 }
  0x42   :  { %374 = vmatpush3.bf16.msra.mxu0 %v373_v15 }
  0x43   :  { %375 = vmatprep.subr.bf16.mxu0 %v510_v0  ;;  %p484_p13 = por %p483_p12, %p482_p11 }
  0x44   :  { %392 = vmatpush3.bf16.msra.mxu1 %v391_v24 }
  0x45   :  { %393 = vmatprep.subr.bf16.mxu1 %v510_v0  ;;  %p485_p0 = pnand %p484_p13, %p478_p10 }
  0x46   :  { %377 = vmatpush3.bf16.msra.mxu0 %v376_v21 }
  0x47   :  { %378 = vmatprep.subr.bf16.mxu0 %v510_v0 }
  0x48   :  { %395 = vmatpush3.bf16.msra.mxu1 %v394_v30 }
  0x49   :  { %396 = vmatprep.subr.bf16.mxu1 %v510_v0 }
  0x4a   :  { %380 = vmatpush3.bf16.msra.mxu0 %v379_v27 }
  0x4b   :  { %381 = vmatprep.subr.bf16.mxu0 %v510_v0 }
  0x4c   :  { %398 = vmatpush3.bf16.msra.mxu1 %v397_v34 }
  0x4d   :  { %399 = vmatprep.subr.bf16.mxu1 %v510_v0 }
  0x4e   :  { %383 = vmatpush3.bf16.msra.mxu0 %v382_v33 }
  0x4f   :  { %332 = vmatprep.subr.mxu0 %v512_v1 }
  0x50   :  { %401 = vmatpush3.bf16.msra.mxu1 %v400_v39 }
  0x51   :  { %361 = vmatprep.subr.mxu1 %v512_v1 }
  0x52   :  { %333 = vmatpush3.msk.msra.mxu0 %vm85_vm1, %v73_v35 }
  0x53   :  { %335 = vmatmul.mubr.msk.f32.vlgmr.msra.gmra.mrb[0].mxu0 %vm81_vm2, %v60_v36 }
  0x54   :  { %362 = vmatpush3.msk.msra.mxu1 %vm85_vm1, %v172_v40 }
 0x126   :  { %v155_v42 = vpop.f32.mrb[0].mxu0 }
 0x127   :  { %v156_v43 = vadd.f32 %v274_v41, %v155_v42  ;;  %v336_v44 = vpop.f32.mrb[1].mxu0 }
 0x129   :  { %v159_v45 = vmax.f32 %v156_v43, 0.0 }
 0x12b   :  { %364 = vmatmul.mubr.msk.f32.vlgmr.msra.gmra.mrb[0].mxu1 %vm81_vm2, %v159_v45 }
 0x1fe   :  { %v252_v47 = vpop.f32.mrb[0].mxu1 }
 0x1ff   :  { %v253_v48 = vadd.f32 %v277_v46, %v252_v47  ;;  %v365_v49 = vpop.f32.mrb[1].mxu1 }
 0x201   :  { %v256_v50 = vmax.f32 %v253_v48, 0.0 }
 0x203   :  { %257 = vst.msk [vmem:[#allocation8] sm:$0xff] %vm81_vm2, %v256_v50 }
 0x204   :  { %488 = shalt.err (!%p485_p0)
}
 0x205   :  { %s489_s4 = scalar_lea.hbm %s628_s5, 128 }
 0x206   :  { %p490_p1 = scmp.ne.s32.totalorder %s628_s5, %s489_s4  ;;  %p493_p2 = scmp.lt.u32.totalorder %s489_s4, %s628_s5 }
 0x208   :  { %p495_p3 = pnand %p493_p2, %p490_p1 }
 0x20a   :  { %498 = shalt.err (!%p495_p3)
}
 0x20b   :  { %267 = dma.vmem_to_hbm [thread:$0]  %s265_s8, 128, %s628_s5, [#allocation4]  }
 0x20c   :  { %503 = dma.done.wait [#allocation4], 128  }
 0x20d   :  { %504 = vsyncadd [#allocation4], 4294967168 }
 0x20e   :  { %271 = vsyncpa [#allocation3], 1 }
 0x20f   :  { %272 = vsyncpa [#allocation6], 1 }
 0x210   :  { %273 = vsyncpa [#allocation4], 1 }

</bundles_post_ra>
